<compile_context>
chip_gen: v5e
topology: v5e:2x2
jax: 0.10.0
libtpu: 0.0.40
codegen_flags: <defaults>
</compile_context>

<pallas_src>
import jax
import jax.numpy as jnp
import numpy as np
from jax.experimental import pallas as pl
from jax.experimental.pallas import tpu as pltpu

# ----------------------------- "CLIPConfig" ---------------------------------
EMBED_DIM = 32                 # config.hidden_size
NUM_HEADS = 4                  # config.num_attention_heads
HEAD_DIM = EMBED_DIM // NUM_HEADS
INTERMEDIATE = 4 * EMBED_DIM   # config.intermediate_size (=128)
LN_EPS = 1e-5                  # config.layer_norm_eps
ATTN_SCALE = HEAD_DIM ** -0.5

# adapter_config
ADAPTER_HIDDEN = 8
ADAPTER_NON_LINEAR = False     # Identity activation inside the adapter (fusion requires this)
# TODO(synk): dropout inside AdapterLayer is eval-mode identity here (no in-kernel RNG needed).

BATCH = 2
SEQ = 8

# Packed (8, 128) small-vector slab row offsets (static).
_ROW_LN1_W, _ROW_LN1_B = 0, 1
_ROW_BQKV = 2                  # fused (adapter-folded, Q-scaled) qkv bias, 96 lanes
_ROW_BO = 3
_ROW_LN2_W, _ROW_LN2_B = 4, 5
_ROW_FC1_B = 6                 # fused (adapter-folded) fc1 bias, 128 lanes
_ROW_FC2_B = 7
_VEC_ROWS, _VEC_LANES = 8, 128

_MASK_NEG = -1e9


# ------------------------------ kernel helpers -------------------------------
def _layer_norm(x, w, b):
    mu = jnp.mean(x, axis=-1, keepdims=True)
    var = jnp.mean((x - mu) ** 2, axis=-1, keepdims=True)
    return (x - mu) * jax.lax.rsqrt(var + LN_EPS) * w + b


# --------------------------------- kernel ------------------------------------
def clip_adapter_layer_kernel(x_ref, mask_ref, w_ref, fc2_ref, vec_ref, out_ref):
    D = EMBED_DIM
    x = x_ref[...]               # (B*S, D)
    mask = mask_ref[...]         # (B*S, B*S) block-diagonal combined additive mask
    w = w_ref[...]               # (D, 256) packed weight slab
    vec = vec_ref[...]           # (8, 128) packed small-vector slab

    # static lane-slices of the weight slab
    wqkv = w[:, 0:3 * D]                      # (D, 3D)   adapter-folded, Q cols pre-scaled
    wo = w[:, 3 * D:4 * D]                    # (D, D)
    fc1 = w[:, 4 * D:4 * D + INTERMEDIATE]    # (D, 128)  adapter-folded

    ln1_w = vec[_ROW_LN1_W:_ROW_LN1_W + 1, :D]
    ln1_b = vec[_ROW_LN1_B:_ROW_LN1_B + 1, :D]
    bqkv = vec[_ROW_BQKV:_ROW_BQKV + 1, :3 * D]
    bo = vec[_ROW_BO:_ROW_BO + 1, :D]
    ln2_w = vec[_ROW_LN2_W:_ROW_LN2_W + 1, :D]
    ln2_b = vec[_ROW_LN2_B:_ROW_LN2_B + 1, :D]
    fc1_b = vec[_ROW_FC1_B:_ROW_FC1_B + 1, :INTERMEDIATE]
    fc2_b = vec[_ROW_FC2_B:_ROW_FC2_B + 1, :D]

    # ---- attention branch (LN1 -> adapter folded into QKV -> MHA) ----
    h = _layer_norm(x, ln1_w, ln1_b)
    qkv = jnp.dot(h, wqkv, preferred_element_type=jnp.float32) + bqkv     # (B*S, 3D)
    q = qkv[:, 0:D]            # already scaled by HEAD_DIM**-0.5 (folded in wrapper)
    k = qkv[:, D:2 * D]
    v = qkv[:, 2 * D:3 * D]

    # head-batched attention: one score einsum, ONE softmax pass, one context einsum
    q3 = jnp.stack([q[:, i * HEAD_DIM:(i + 1) * HEAD_DIM] for i in range(NUM_HEADS)], axis=0)
    k3 = jnp.stack([k[:, i * HEAD_DIM:(i + 1) * HEAD_DIM] for i in range(NUM_HEADS)], axis=0)
    v3 = jnp.stack([v[:, i * HEAD_DIM:(i + 1) * HEAD_DIM] for i in range(NUM_HEADS)], axis=0)

    scores = jnp.einsum('hqd,hkd->hqk', q3, k3,
                        preferred_element_type=jnp.float32) + mask        # (H, B*S, B*S)
    scores = scores - jnp.max(scores, axis=-1, keepdims=True)
    p = jnp.exp(scores)
    p = p * pl.reciprocal(jnp.sum(p, axis=-1, keepdims=True), approx=False)
    ctx = jnp.einsum('hqk,hkd->hqd', p, v3,
                     preferred_element_type=jnp.float32)                  # (H, B*S, Dh)
    ctx2 = jnp.concatenate([ctx[i] for i in range(NUM_HEADS)], axis=-1)   # (B*S, D)

    attn_out = jnp.dot(ctx2, wo, preferred_element_type=jnp.float32) + bo
    h = x + attn_out

    # ---- MLP branch (LN2 -> adapter folded into FC1 -> quick_gelu -> FC2) ----
    g = _layer_norm(h, ln2_w, ln2_b)
    m = jnp.dot(g, fc1, preferred_element_type=jnp.float32) + fc1_b
    m = m * jax.nn.sigmoid(1.702 * m)                                     # CLIP quick_gelu
    m = jnp.dot(m, fc2_ref[...], preferred_element_type=jnp.float32) + fc2_b

    out_ref[...] = h + m


# --------------------------------- wrapper ------------------------------------
def _fuse_params(p):
    """Fold adapters + attention scale into downstream weights; pack operand slabs."""
    assert not ADAPTER_NON_LINEAR, "adapter fusion only valid for Identity activation"
    D = EMBED_DIM
    eye = jnp.eye(D, dtype=jnp.float32)

    # adapter(x) = x @ (I + wa@wb) + (ba@wb + bb)   (non_linear=False, eval dropout)
    w_attn = eye + p["aattn_wa"] @ p["aattn_wb"]
    b_attn = p["aattn_ba"] @ p["aattn_wb"] + p["aattn_bb"]          # (1, D)
    w_mlp = eye + p["amlp_wa"] @ p["amlp_wb"]
    b_mlp = p["amlp_ba"] @ p["amlp_wb"] + p["amlp_bb"]              # (1, D)

    # fused QKV, then fold the attention adapter and the Q scale into it
    wqkv = jnp.concatenate([p["wq"], p["wk"], p["wv"]], axis=1)     # (D, 3D)
    bqkv = jnp.concatenate([p["bq"], p["bk"], p["bv"]], axis=1)     # (1, 3D)
    wqkv_f = w_attn @ wqkv
    bqkv_f = b_attn @ wqkv + bqkv
    wqkv_f = wqkv_f.at[:, :D].multiply(ATTN_SCALE)
    bqkv_f = bqkv_f.at[:, :D].multiply(ATTN_SCALE)

    # fold the MLP adapter into FC1
    fc1_f = w_mlp @ p["fc1_w"]                                      # (D, 128)
    fc1b_f = b_mlp @ p["fc1_w"] + p["fc1_b"]                        # (1, 128)

    # packed weight slab (D, 3D + D + INTERMEDIATE) = (32, 256)
    wslab = jnp.concatenate([wqkv_f, p["wo"], fc1_f], axis=1)

    # packed small-vector slab (8, 128)
    vec = jnp.zeros((_VEC_ROWS, _VEC_LANES), jnp.float32)
    vec = vec.at[_ROW_LN1_W, :D].set(p["ln1_w"][0])
    vec = vec.at[_ROW_LN1_B, :D].set(p["ln1_b"][0])
    vec = vec.at[_ROW_BQKV, :3 * D].set(bqkv_f[0])
    vec = vec.at[_ROW_BO, :D].set(p["bo"][0])
    vec = vec.at[_ROW_LN2_W, :D].set(p["ln2_w"][0])
    vec = vec.at[_ROW_LN2_B, :D].set(p["ln2_b"][0])
    vec = vec.at[_ROW_FC1_B, :INTERMEDIATE].set(fc1b_f[0])
    vec = vec.at[_ROW_FC2_B, :D].set(p["fc2_b"][0])

    return wslab, p["fc2_w"], vec


def clip_encoder_adapter_layer(hidden_states, attention_mask, causal_attention_mask, params):
    B, S, D = hidden_states.shape
    wslab, fc2_w, vec = _fuse_params(params)

    # Combine the two additive masks and lay them out block-diagonally so both batch
    # elements can run in ONE kernel invocation on the flattened (B*S, D) input
    # (cross-batch positions get a large negative -> zero attention weight).
    combined = (attention_mask + causal_attention_mask)[:, 0]      # (B, S, S)
    mask_full = jnp.full((B * S, B * S), _MASK_NEG, jnp.float32)
    for b in range(B):
        mask_full = mask_full.at[b * S:(b + 1) * S, b * S:(b + 1) * S].set(combined[b])

    x_flat = hidden_states.reshape(B * S, D)

    def vmem_spec():
        return pl.BlockSpec(memory_space=pltpu.MemorySpace.VMEM)

    out_flat = pl.pallas_call(
        clip_adapter_layer_kernel,
        out_shape=jax.ShapeDtypeStruct((B * S, D), hidden_states.dtype),
        in_specs=[vmem_spec() for _ in range(5)],
        out_specs=vmem_spec(),
    )(x_flat, mask_full, wslab, fc2_w, vec)

    return out_flat.reshape(B, S, D)


# --------------------------- deterministic params ----------------------------
def init_params(key):
    keys = jax.random.split(key, 32)
    it = iter(keys)

    def lin(fan_in, fan_out):
        # weight stored pre-transposed as (in, out); bias as (1, out)
        w = jax.random.normal(next(it), (fan_in, fan_out), jnp.float32) * 0.02
        b = jax.random.normal(next(it), (1, fan_out), jnp.float32) * 0.02
        return w, b

    p = {}
    p["ln1_w"] = jnp.ones((1, EMBED_DIM), jnp.float32)
    p["ln1_b"] = jnp.zeros((1, EMBED_DIM), jnp.float32)
    p["ln2_w"] = jnp.ones((1, EMBED_DIM), jnp.float32)
    p["ln2_b"] = jnp.zeros((1, EMBED_DIM), jnp.float32)
    p["wq"], p["bq"] = lin(EMBED_DIM, EMBED_DIM)
    p["wk"], p["bk"] = lin(EMBED_DIM, EMBED_DIM)
    p["wv"], p["bv"] = lin(EMBED_DIM, EMBED_DIM)
    p["wo"], p["bo"] = lin(EMBED_DIM, EMBED_DIM)
    p["aattn_wa"], p["aattn_ba"] = lin(EMBED_DIM, ADAPTER_HIDDEN)
    p["aattn_wb"], p["aattn_bb"] = lin(ADAPTER_HIDDEN, EMBED_DIM)
    p["amlp_wa"], p["amlp_ba"] = lin(EMBED_DIM, ADAPTER_HIDDEN)
    p["amlp_wb"], p["amlp_bb"] = lin(ADAPTER_HIDDEN, EMBED_DIM)
    p["fc1_w"], p["fc1_b"] = lin(EMBED_DIM, INTERMEDIATE)
    p["fc2_w"], p["fc2_b"] = lin(INTERMEDIATE, EMBED_DIM)
    return p


# ------------------------------ pure-JAX reference ---------------------------
def _adapter_ref(x, wa, ba, wb, bb):
    down = x @ wa + ba
    if ADAPTER_NON_LINEAR:
        down = down * jax.nn.sigmoid(down)     # SiLU
    return down @ wb + bb + x


def reference(hidden_states, attention_mask, causal_attention_mask, p):
    def per_example(x, am, cm):
        residual = x
        h = _layer_norm(x, p["ln1_w"], p["ln1_b"])
        h = _adapter_ref(h, p["aattn_wa"], p["aattn_ba"], p["aattn_wb"], p["aattn_bb"])
        q = (h @ p["wq"] + p["bq"]) * ATTN_SCALE
        k = h @ p["wk"] + p["bk"]
        v = h @ p["wv"] + p["bv"]
        attn_acc = jnp.zeros_like(x)
        for hd in range(NUM_HEADS):
            lo, hi = hd * HEAD_DIM, (hd + 1) * HEAD_DIM
            scores = q[:, lo:hi] @ k[:, lo:hi].T + cm + am
            pmat = jax.nn.softmax(scores, axis=-1)
            attn_acc = attn_acc + (pmat @ v[:, lo:hi]) @ p["wo"][lo:hi, :]
        h = residual + attn_acc + p["bo"]
        residual = h
        h = _layer_norm(h, p["ln2_w"], p["ln2_b"])
        h = _adapter_ref(h, p["amlp_wa"], p["amlp_ba"], p["amlp_wb"], p["amlp_bb"])
        m = h @ p["fc1_w"] + p["fc1_b"]
        m = m * jax.nn.sigmoid(1.702 * m)
        m = m @ p["fc2_w"] + p["fc2_b"]
        return residual + m

    return jax.vmap(lambda x, am, cm: per_example(x, am[0], cm[0]))(
        hidden_states, attention_mask, causal_attention_mask)


# ----------------------------------- main -------------------------------------
if __name__ == "__main__":
    key = jax.random.PRNGKey(0)
    k_x, k_p = jax.random.split(key)

    hidden_states = jax.random.normal(k_x, (BATCH, SEQ, EMBED_DIM), jnp.float32)
    # additive attention mask (zeros = no masking), HF CLIP convention
    attention_mask = jnp.zeros((BATCH, 1, SEQ, SEQ), jnp.float32)
    # additive causal mask: large negative above the diagonal
    causal = jnp.where(
        jnp.arange(SEQ)[:, None] >= jnp.arange(SEQ)[None, :], 0.0, _MASK_NEG
    ).astype(jnp.float32)
    causal_attention_mask = jnp.broadcast_to(causal, (BATCH, 1, SEQ, SEQ))

    params = init_params(k_p)

    out = clip_encoder_adapter_layer(
        hidden_states, attention_mask, causal_attention_mask, params)
    out = jax.block_until_ready(out)

    ref = jax.block_until_ready(
        reference(hidden_states, attention_mask, causal_attention_mask, params))

    assert out.shape == (BATCH, SEQ, EMBED_DIM)
    assert np.allclose(np.asarray(out), np.asarray(ref), rtol=1e-2, atol=1e-2), (
        "Pallas kernel diverged from JAX reference")

    print("KERNEL_OK")
</pallas_src>

<mosaic_0001>
module attributes {stable_mosaic.version = 11 : i64} {
  func.func @clip_adapter_layer_kernel(%arg0: memref<16x32xf32, #tpu.memory_space<vmem>>, %arg1: memref<16x16xf32, #tpu.memory_space<vmem>>, %arg2: memref<32x256xf32, #tpu.memory_space<vmem>>, %arg3: memref<128x32xf32, #tpu.memory_space<vmem>>, %arg4: memref<8x128xf32, #tpu.memory_space<vmem>>, %arg5: memref<16x32xf32, #tpu.memory_space<vmem>>) attributes {dimension_semantics = [], scalar_prefetch = 0 : i64, scratch_operands = 0 : i64, tpu.core_type = #tpu.core_type<tc>} {
    %c0 = arith.constant 0 : index
    %c0_0 = arith.constant 0 : index
    %0 = vector.load %arg0[%c0, %c0_0] : memref<16x32xf32, #tpu.memory_space<vmem>>, vector<16x32xf32>
    %c0_1 = arith.constant 0 : index
    %c0_2 = arith.constant 0 : index
    %1 = vector.load %arg1[%c0_1, %c0_2] : memref<16x16xf32, #tpu.memory_space<vmem>>, vector<16x16xf32>
    %c0_3 = arith.constant 0 : index
    %c0_4 = arith.constant 0 : index
    %2 = vector.load %arg2[%c0_3, %c0_4] : memref<32x256xf32, #tpu.memory_space<vmem>>, vector<32x256xf32>
    %c0_5 = arith.constant 0 : index
    %c0_6 = arith.constant 0 : index
    %3 = vector.load %arg4[%c0_5, %c0_6] : memref<8x128xf32, #tpu.memory_space<vmem>>, vector<8x128xf32>
    %4 = vector.extract_strided_slice %2 {offsets = [0, 0], sizes = [32, 96], strides = [1, 1]} : vector<32x256xf32> to vector<32x96xf32>
    %5 = vector.extract_strided_slice %2 {offsets = [0, 96], sizes = [32, 32], strides = [1, 1]} : vector<32x256xf32> to vector<32x32xf32>
    %6 = vector.extract_strided_slice %2 {offsets = [0, 128], sizes = [32, 128], strides = [1, 1]} : vector<32x256xf32> to vector<32x128xf32>
    %7 = vector.extract_strided_slice %3 {offsets = [0, 0], sizes = [1, 32], strides = [1, 1]} : vector<8x128xf32> to vector<1x32xf32>
    %8 = vector.extract_strided_slice %3 {offsets = [1, 0], sizes = [1, 32], strides = [1, 1]} : vector<8x128xf32> to vector<1x32xf32>
    %9 = vector.extract_strided_slice %3 {offsets = [2, 0], sizes = [1, 96], strides = [1, 1]} : vector<8x128xf32> to vector<1x96xf32>
    %10 = vector.extract_strided_slice %3 {offsets = [3, 0], sizes = [1, 32], strides = [1, 1]} : vector<8x128xf32> to vector<1x32xf32>
    %11 = vector.extract_strided_slice %3 {offsets = [4, 0], sizes = [1, 32], strides = [1, 1]} : vector<8x128xf32> to vector<1x32xf32>
    %12 = vector.extract_strided_slice %3 {offsets = [5, 0], sizes = [1, 32], strides = [1, 1]} : vector<8x128xf32> to vector<1x32xf32>
    %13 = vector.extract_strided_slice %3 {offsets = [6, 0], sizes = [1, 128], strides = [1, 1]} : vector<8x128xf32> to vector<1x128xf32>
    %14 = vector.extract_strided_slice %3 {offsets = [7, 0], sizes = [1, 32], strides = [1, 1]} : vector<8x128xf32> to vector<1x32xf32>
    %cst = arith.constant dense<0.000000e+00> : vector<16xf32>
    %15 = vector.multi_reduction <add>, %0, %cst [1] : vector<16x32xf32> to vector<16xf32>
    %16 = vector.shape_cast %15 : vector<16xf32> to vector<16x1xf32>
    %cst_7 = arith.constant 3.200000e+01 : f32
    %17 = vector.broadcast %cst_7 : f32 to vector<16x1xf32>
    %18 = arith.divf %16, %17 : vector<16x1xf32>
    %19 = vector.broadcast %18 : vector<16x1xf32> to vector<16x32xf32>
    %20 = arith.subf %0, %19 : vector<16x32xf32>
    %21 = arith.mulf %20, %20 : vector<16x32xf32>
    %cst_8 = arith.constant dense<0.000000e+00> : vector<16xf32>
    %22 = vector.multi_reduction <add>, %21, %cst_8 [1] : vector<16x32xf32> to vector<16xf32>
    %23 = vector.shape_cast %22 : vector<16xf32> to vector<16x1xf32>
    %cst_9 = arith.constant 3.200000e+01 : f32
    %24 = vector.broadcast %cst_9 : f32 to vector<16x1xf32>
    %25 = arith.divf %23, %24 : vector<16x1xf32>
    %26 = vector.broadcast %18 : vector<16x1xf32> to vector<16x32xf32>
    %27 = arith.subf %0, %26 : vector<16x32xf32>
    %cst_10 = arith.constant 9.99999974E-6 : f32
    %28 = vector.broadcast %cst_10 : f32 to vector<16x1xf32>
    %29 = arith.addf %25, %28 : vector<16x1xf32>
    %30 = math.rsqrt %29 : vector<16x1xf32>
    %31 = vector.broadcast %30 : vector<16x1xf32> to vector<16x32xf32>
    %32 = arith.mulf %27, %31 : vector<16x32xf32>
    %33 = vector.broadcast %7 : vector<1x32xf32> to vector<16x32xf32>
    %34 = arith.mulf %32, %33 : vector<16x32xf32>
    %35 = vector.broadcast %8 : vector<1x32xf32> to vector<16x32xf32>
    %36 = arith.addf %34, %35 : vector<16x32xf32>
    %cst_11 = arith.constant dense<0.000000e+00> : vector<16x96xf32>
    %37 = tpu.matmul %36, %4, %cst_11 {dimension_numbers = #tpu.dot_dimension_numbers<[1], [0], [0], [1], [0, 0, 1, 1], [], []>} : vector<16x32xf32>, vector<32x96xf32>, vector<16x96xf32> -> vector<16x96xf32>
    %38 = vector.broadcast %9 : vector<1x96xf32> to vector<16x96xf32>
    %39 = arith.addf %37, %38 : vector<16x96xf32>
    %40 = vector.extract_strided_slice %39 {offsets = [0, 0], sizes = [16, 32], strides = [1, 1]} : vector<16x96xf32> to vector<16x32xf32>
    %41 = vector.extract_strided_slice %39 {offsets = [0, 32], sizes = [16, 32], strides = [1, 1]} : vector<16x96xf32> to vector<16x32xf32>
    %42 = vector.extract_strided_slice %39 {offsets = [0, 64], sizes = [16, 32], strides = [1, 1]} : vector<16x96xf32> to vector<16x32xf32>
    %43 = vector.extract_strided_slice %40 {offsets = [0, 0], sizes = [16, 8], strides = [1, 1]} : vector<16x32xf32> to vector<16x8xf32>
    %44 = vector.extract_strided_slice %40 {offsets = [0, 8], sizes = [16, 8], strides = [1, 1]} : vector<16x32xf32> to vector<16x8xf32>
    %45 = vector.extract_strided_slice %40 {offsets = [0, 16], sizes = [16, 8], strides = [1, 1]} : vector<16x32xf32> to vector<16x8xf32>
    %46 = vector.extract_strided_slice %40 {offsets = [0, 24], sizes = [16, 8], strides = [1, 1]} : vector<16x32xf32> to vector<16x8xf32>
    %47 = vector.shape_cast %43 : vector<16x8xf32> to vector<1x16x8xf32>
    %48 = vector.shape_cast %44 : vector<16x8xf32> to vector<1x16x8xf32>
    %49 = vector.shape_cast %45 : vector<16x8xf32> to vector<1x16x8xf32>
    %50 = vector.shape_cast %46 : vector<16x8xf32> to vector<1x16x8xf32>
    %51 = tpu.concatenate %47, %48, %49, %50 in 0 : vector<1x16x8xf32>, vector<1x16x8xf32>, vector<1x16x8xf32>, vector<1x16x8xf32> -> vector<4x16x8xf32>
    %52 = vector.extract_strided_slice %41 {offsets = [0, 0], sizes = [16, 8], strides = [1, 1]} : vector<16x32xf32> to vector<16x8xf32>
    %53 = vector.extract_strided_slice %41 {offsets = [0, 8], sizes = [16, 8], strides = [1, 1]} : vector<16x32xf32> to vector<16x8xf32>
    %54 = vector.extract_strided_slice %41 {offsets = [0, 16], sizes = [16, 8], strides = [1, 1]} : vector<16x32xf32> to vector<16x8xf32>
    %55 = vector.extract_strided_slice %41 {offsets = [0, 24], sizes = [16, 8], strides = [1, 1]} : vector<16x32xf32> to vector<16x8xf32>
    %56 = vector.shape_cast %52 : vector<16x8xf32> to vector<1x16x8xf32>
    %57 = vector.shape_cast %53 : vector<16x8xf32> to vector<1x16x8xf32>
    %58 = vector.shape_cast %54 : vector<16x8xf32> to vector<1x16x8xf32>
    %59 = vector.shape_cast %55 : vector<16x8xf32> to vector<1x16x8xf32>
    %60 = tpu.concatenate %56, %57, %58, %59 in 0 : vector<1x16x8xf32>, vector<1x16x8xf32>, vector<1x16x8xf32>, vector<1x16x8xf32> -> vector<4x16x8xf32>
    %61 = vector.extract_strided_slice %42 {offsets = [0, 0], sizes = [16, 8], strides = [1, 1]} : vector<16x32xf32> to vector<16x8xf32>
    %62 = vector.extract_strided_slice %42 {offsets = [0, 8], sizes = [16, 8], strides = [1, 1]} : vector<16x32xf32> to vector<16x8xf32>
    %63 = vector.extract_strided_slice %42 {offsets = [0, 16], sizes = [16, 8], strides = [1, 1]} : vector<16x32xf32> to vector<16x8xf32>
    %64 = vector.extract_strided_slice %42 {offsets = [0, 24], sizes = [16, 8], strides = [1, 1]} : vector<16x32xf32> to vector<16x8xf32>
    %65 = vector.shape_cast %61 : vector<16x8xf32> to vector<1x16x8xf32>
    %66 = vector.shape_cast %62 : vector<16x8xf32> to vector<1x16x8xf32>
    %67 = vector.shape_cast %63 : vector<16x8xf32> to vector<1x16x8xf32>
    %68 = vector.shape_cast %64 : vector<16x8xf32> to vector<1x16x8xf32>
    %69 = tpu.concatenate %65, %66, %67, %68 in 0 : vector<1x16x8xf32>, vector<1x16x8xf32>, vector<1x16x8xf32>, vector<1x16x8xf32> -> vector<4x16x8xf32>
    "tpu.trace_start"() <{level = 10 : i32, message = "hqd,hkd->hqk"}> : () -> ()
    %cst_12 = arith.constant dense<0.000000e+00> : vector<4x16x16xf32>
    %70 = tpu.matmul %51, %60, %cst_12 {dimension_numbers = #tpu.dot_dimension_numbers<[2], [2], [1], [1], [0, 0, 0, 1, 1, 1], [0], [0]>} : vector<4x16x8xf32>, vector<4x16x8xf32>, vector<4x16x16xf32> -> vector<4x16x16xf32>
    "tpu.trace_stop"() : () -> ()
    %71 = vector.shape_cast %1 : vector<16x16xf32> to vector<1x16x16xf32>
    %72 = vector.broadcast %71 : vector<1x16x16xf32> to vector<4x16x16xf32>
    %73 = arith.addf %70, %72 : vector<4x16x16xf32>
    %cst_13 = arith.constant dense<0xFF800000> : vector<4x16xf32>
    %74 = vector.multi_reduction <maximumf>, %73, %cst_13 [2] : vector<4x16x16xf32> to vector<4x16xf32>
    %75 = vector.shape_cast %74 : vector<4x16xf32> to vector<4x16x1xf32>
    %76 = vector.broadcast %75 : vector<4x16x1xf32> to vector<4x16x16xf32>
    %77 = arith.subf %73, %76 : vector<4x16x16xf32>
    %78 = math.exp %77 : vector<4x16x16xf32>
    %cst_14 = arith.constant dense<0.000000e+00> : vector<4x16xf32>
    %79 = vector.multi_reduction <add>, %78, %cst_14 [2] : vector<4x16x16xf32> to vector<4x16xf32>
    %80 = vector.shape_cast %79 : vector<4x16xf32> to vector<4x16x1xf32>
    %81 = tpu.reciprocal %80 : vector<4x16x1xf32> -> vector<4x16x1xf32>
    %82 = vector.broadcast %81 : vector<4x16x1xf32> to vector<4x16x16xf32>
    %83 = arith.mulf %78, %82 : vector<4x16x16xf32>
    "tpu.trace_start"() <{level = 10 : i32, message = "hqk,hkd->hqd"}> : () -> ()
    %cst_15 = arith.constant dense<0.000000e+00> : vector<4x16x8xf32>
    %84 = tpu.matmul %83, %69, %cst_15 {dimension_numbers = #tpu.dot_dimension_numbers<[2], [1], [1], [2], [0, 0, 0, 1, 1, 2], [0], [0]>} : vector<4x16x16xf32>, vector<4x16x8xf32>, vector<4x16x8xf32> -> vector<4x16x8xf32>
    "tpu.trace_stop"() : () -> ()
    %85 = vector.extract_strided_slice %84 {offsets = [0, 0, 0], sizes = [1, 16, 8], strides = [1, 1, 1]} : vector<4x16x8xf32> to vector<1x16x8xf32>
    %86 = vector.shape_cast %85 : vector<1x16x8xf32> to vector<16x8xf32>
    %87 = vector.extract_strided_slice %84 {offsets = [1, 0, 0], sizes = [1, 16, 8], strides = [1, 1, 1]} : vector<4x16x8xf32> to vector<1x16x8xf32>
    %88 = vector.shape_cast %87 : vector<1x16x8xf32> to vector<16x8xf32>
    %89 = vector.extract_strided_slice %84 {offsets = [2, 0, 0], sizes = [1, 16, 8], strides = [1, 1, 1]} : vector<4x16x8xf32> to vector<1x16x8xf32>
    %90 = vector.shape_cast %89 : vector<1x16x8xf32> to vector<16x8xf32>
    %91 = vector.extract_strided_slice %84 {offsets = [3, 0, 0], sizes = [1, 16, 8], strides = [1, 1, 1]} : vector<4x16x8xf32> to vector<1x16x8xf32>
    %92 = vector.shape_cast %91 : vector<1x16x8xf32> to vector<16x8xf32>
    %93 = tpu.concatenate %86, %88, %90, %92 in 1 : vector<16x8xf32>, vector<16x8xf32>, vector<16x8xf32>, vector<16x8xf32> -> vector<16x32xf32>
    %cst_16 = arith.constant dense<0.000000e+00> : vector<16x32xf32>
    %94 = tpu.matmul %93, %5, %cst_16 {dimension_numbers = #tpu.dot_dimension_numbers<[1], [0], [0], [1], [0, 0, 1, 1], [], []>} : vector<16x32xf32>, vector<32x32xf32>, vector<16x32xf32> -> vector<16x32xf32>
    %95 = vector.broadcast %10 : vector<1x32xf32> to vector<16x32xf32>
    %96 = arith.addf %94, %95 : vector<16x32xf32>
    %97 = arith.addf %0, %96 : vector<16x32xf32>
    %cst_17 = arith.constant dense<0.000000e+00> : vector<16xf32>
    %98 = vector.multi_reduction <add>, %97, %cst_17 [1] : vector<16x32xf32> to vector<16xf32>
    %99 = vector.shape_cast %98 : vector<16xf32> to vector<16x1xf32>
    %cst_18 = arith.constant 3.200000e+01 : f32
    %100 = vector.broadcast %cst_18 : f32 to vector<16x1xf32>
    %101 = arith.divf %99, %100 : vector<16x1xf32>
    %102 = vector.broadcast %101 : vector<16x1xf32> to vector<16x32xf32>
    %103 = arith.subf %97, %102 : vector<16x32xf32>
    %104 = arith.mulf %103, %103 : vector<16x32xf32>
    %cst_19 = arith.constant dense<0.000000e+00> : vector<16xf32>
    %105 = vector.multi_reduction <add>, %104, %cst_19 [1] : vector<16x32xf32> to vector<16xf32>
    %106 = vector.shape_cast %105 : vector<16xf32> to vector<16x1xf32>
    %cst_20 = arith.constant 3.200000e+01 : f32
    %107 = vector.broadcast %cst_20 : f32 to vector<16x1xf32>
    %108 = arith.divf %106, %107 : vector<16x1xf32>
    %109 = vector.broadcast %101 : vector<16x1xf32> to vector<16x32xf32>
    %110 = arith.subf %97, %109 : vector<16x32xf32>
    %cst_21 = arith.constant 9.99999974E-6 : f32
    %111 = vector.broadcast %cst_21 : f32 to vector<16x1xf32>
    %112 = arith.addf %108, %111 : vector<16x1xf32>
    %113 = math.rsqrt %112 : vector<16x1xf32>
    %114 = vector.broadcast %113 : vector<16x1xf32> to vector<16x32xf32>
    %115 = arith.mulf %110, %114 : vector<16x32xf32>
    %116 = vector.broadcast %11 : vector<1x32xf32> to vector<16x32xf32>
    %117 = arith.mulf %115, %116 : vector<16x32xf32>
    %118 = vector.broadcast %12 : vector<1x32xf32> to vector<16x32xf32>
    %119 = arith.addf %117, %118 : vector<16x32xf32>
    %cst_22 = arith.constant dense<0.000000e+00> : vector<16x128xf32>
    %120 = tpu.matmul %119, %6, %cst_22 {dimension_numbers = #tpu.dot_dimension_numbers<[1], [0], [0], [1], [0, 0, 1, 1], [], []>} : vector<16x32xf32>, vector<32x128xf32>, vector<16x128xf32> -> vector<16x128xf32>
    %121 = vector.broadcast %13 : vector<1x128xf32> to vector<16x128xf32>
    %122 = arith.addf %120, %121 : vector<16x128xf32>
    %cst_23 = arith.constant 1.702000e+00 : f32
    %123 = vector.broadcast %cst_23 : f32 to vector<16x128xf32>
    %124 = arith.mulf %123, %122 : vector<16x128xf32>
    %125 = arith.negf %124 : vector<16x128xf32>
    %126 = math.exp %125 : vector<16x128xf32>
    %cst_24 = arith.constant 1.000000e+00 : f32
    %127 = vector.broadcast %cst_24 : f32 to vector<16x128xf32>
    %128 = arith.addf %127, %126 : vector<16x128xf32>
    %129 = arith.divf %127, %128 : vector<16x128xf32>
    %130 = arith.mulf %122, %129 : vector<16x128xf32>
    %c0_25 = arith.constant 0 : index
    %c0_26 = arith.constant 0 : index
    %131 = vector.load %arg3[%c0_25, %c0_26] : memref<128x32xf32, #tpu.memory_space<vmem>>, vector<128x32xf32>
    %cst_27 = arith.constant dense<0.000000e+00> : vector<16x32xf32>
    %132 = tpu.matmul %130, %131, %cst_27 {dimension_numbers = #tpu.dot_dimension_numbers<[1], [0], [0], [1], [0, 0, 1, 1], [], []>} : vector<16x128xf32>, vector<128x32xf32>, vector<16x32xf32> -> vector<16x32xf32>
    %133 = vector.broadcast %14 : vector<1x32xf32> to vector<16x32xf32>
    %134 = arith.addf %132, %133 : vector<16x32xf32>
    %135 = arith.addf %97, %134 : vector<16x32xf32>
    %c0_28 = arith.constant 0 : index
    %c0_29 = arith.constant 0 : index
    %136 = vector.load %arg5[%c0_28, %c0_29] : memref<16x32xf32, #tpu.memory_space<vmem>>, vector<16x32xf32>
    tpu.vector_store %arg5[%c0_28, %c0_29], %135 {strides = array<i32>} : memref<16x32xf32, #tpu.memory_space<vmem>>, vector<16x32xf32>,
    return
  }
}

</mosaic_0001>

<bundles_post_ra>
// kernel: tpu_custom_call.1
= control target key start
LH: loop header
LB: loop body
LE: loop exit
PB: predicated region body
PF: predicated region fallthrough
CT: control target
= control target key end

     0   :  { %vm34_vm0 = vcmask 261120   ;;  %s1459_s0 = inlined_call_operand.vmem [shape: f32[16,32], index: 0, kind: input, shape index: {}]   ;;  %s1460_s1 = inlined_call_operand.vmem [shape: f32[16,16], index: 1, kind: input, shape index: {}]   ;;  %s1461_s2 = inlined_call_operand.vmem [shape: f32[32,256], index: 2, kind: input, shape index: {}]   ;;  %s1462_s3 = inlined_call_operand.vmem [shape: f32[128,32], index: 3, kind: input, shape index: {}]   ;;  %s1463_s4 = inlined_call_operand.vmem [shape: f32[8,128], index: 4, kind: input, shape index: {}]   ;;  %s1464_s5 = inlined_call_operand.hbm [shape: f32[16,32], index: 5, kind: output, shape index: {}]  }
   0x1   :  { %v1071_v0 = vld [vmem:[%s1459_s0] sm:$0xff] }
   0x2   :  { %10 = vsyncpa [#allocation3], 0  ;;  %v35_v1 = vsel %vm34_vm0, %v1071_v0, 0.0  ;;  %v1078_v2 = vld [vmem:[%s1459_s0 + $0x8] sm:$0xff]  ;;  %v1026_v4 = vmov 32.0   ;;  %v1093_v21 = vld [vmem:[%s1461_s2 + $0x30] sm:$0xff] }
   0x3   :  { %36 = vadd.xlane.f32.xlu0 %v35_v1  ;;  %v38_v3 = vsel %vm34_vm0, %v1078_v2, 0.0  ;;  %949 = vrcp.f32 %v1026_v4  ;;  %111 = vmatpush.msra.mxu0 %v1093_v21  ;;  %v1099_v22 = vld [vmem:[%s1461_s2 + $0x20] sm:$0xff]  ;;  %v1105_v23 = vld [vmem:[%s1461_s2 + $0x10] sm:$0xff]  ;;  %s1027_s6 = smov 112   ;;  %s1028_s7 = smov 120   ;;  %vm140_vm8 = vcmask 64512  }
   0x4   :  { %v1111_v24 = vld [vmem:[%s1461_s2] sm:$0xff]  ;;  %v939_v25 = vpack.i.bf16 %v1099_v22, %v1093_v21  ;;  %s1029_s8 = smov 104   ;;  %s1030_s9 = smov 96   ;;  %vm277_vm9 = vcmask 130048  }
   0x5   :  { %112 = vmatpush.msra.mxu0 %v1099_v22  ;;  %v944_v26 = vpack.i.bf16 %v1111_v24, %v1105_v23  ;;  %v1123_v38 = vld [vmem:[%s1463_s4] sm:$0xff]  ;;  %s1032_s14 = smov 32   ;;  %s1033_s15 = smov 16  }
   0x6   :  { %v86_v42 = vperm.slane %v1123_v38, 0  ;;  %v89_v46 = vperm.slane %v1123_v38, 1  ;;  %v92_v56 = vperm.slane %v1123_v38, 2  ;;  %s1034_s16 = smov 24   ;;  %s1035_s17 = smov 8  }
   0x7   :  { %113 = vmatpush.msra.mxu0 %v1105_v23 }
   0x9   :  { %v950_v5 = vpop.eup %949  ;;  %114 = vmatpush.msra.mxu0 %v1111_v24 }
   0xa   :  { %v42_v6 = vmul.f32 32.0, %v950_v5  ;;  %vm46_vm1 = vweird.f32 %v950_v5 }
   0xb   :  { %39 = vadd.xlane.f32.xlu0 %v38_v3 }
   0xc   :  { %v43_v7 = vsub.f32 1.0, %v42_v6 }
   0xe   :  { %v44_v8 = vmul.f32 %v950_v5, %v43_v7 }
  0x10   :  { %v45_v9 = vadd.f32 %v950_v5, %v44_v8 }
  0x12   :  { %v1082_v10 = vsel %vm46_vm1, %v950_v5, %v45_v9 }
  0x76   :  { %v37_v11 = vpop.xlane.xlu0 %36 }
  0x77   :  { %v48_v12 = vmul.f32 %v1082_v10, %v37_v11 }
  0x79   :  { %v50_v13 = vsub.f32 %v1071_v0, %v48_v12 }
  0x7b   :  { %v52_v14 = vmul.f32 %v50_v13, %v50_v13 }
  0x7d   :  { %v54_v15 = vsel %vm34_vm0, %v52_v14, 0.0  ;;  %v23_v14 = vld [vmem:[%s1460_s1] sm:$0xff] }
  0x7e   :  { %55 = vadd.xlane.f32.xlu1 %v54_v15  ;;  %v40_v16 = vpop.xlane.xlu0 %39 }
  0x7f   :  { %v49_v17 = vmul.f32 %v1082_v10, %v40_v16 }
  0x81   :  { %v51_v18 = vsub.f32 %v1078_v2, %v49_v17 }
  0x83   :  { %v53_v19 = vmul.f32 %v51_v18, %v51_v18 }
  0x85   :  { %v57_v20 = vsel %vm34_vm0, %v53_v19, 0.0 }
  0x86   :  { %58 = vadd.xlane.f32.xlu1 %v57_v20 }
  0xf1   :  { %v56_v27 = vpop.xlane.xlu1 %55 }
  0xf2   :  { %v60_v28 = vmul.f32 %v56_v27, %v1082_v10  ;;  %v24_v27 = vld [vmem:[%s1460_s1 + $0x8] sm:$0xff]  ;;  %s1031_s1 = smov 64  }
  0xf4   :  { %v62_v29 = vadd.f32 1e-05, %v60_v28 }
  0xf6   :  { %951 = vrsqrt.f32 %v62_v29  ;;  %vm70_vm3 = vweird.f32 %v62_v29 }
  0xf9   :  { %v59_v30 = vpop.xlane.xlu1 %58 }
  0xfa   :  { %v61_v31 = vmul.f32 %v59_v30, %v1082_v10 }
  0xfc   :  { %v952_v32 = vpop.eup %951  ;;  %v63_v33 = vadd.f32 1e-05, %v61_v31 }
  0xfd   :  { %v65_v34 = vmul.f32 %v952_v32, %v62_v29  ;;  %vm71_vm2 = vweird.f32 %v952_v32 }
  0xfe   :  { %953 = vrsqrt.f32 %v63_v33  ;;  %vm72_vm4 = vmor %vm70_vm3, %vm71_vm2  ;;  %vm80_vm6 = vweird.f32 %v63_v33 }
  0xff   :  { %v66_v35 = vmul.f32 %v952_v32, %v65_v34 }
 0x101   :  { %v67_v36 = vmul.f32 0.5, %v66_v35 }
 0x103   :  { %v68_v37 = vsub.f32 1.5, %v67_v36 }
 0x104   :  { %v954_v39 = vpop.eup %953 }
 0x105   :  { %v69_v40 = vmul.f32 %v952_v32, %v68_v37  ;;  %v75_v41 = vmul.f32 %v954_v39, %v63_v33  ;;  %vm81_vm5 = vweird.f32 %v954_v39 }
 0x106   :  { %vm82_vm7 = vmor %vm80_vm6, %vm81_vm5 }
 0x107   :  { %v73_v43 = vsel %vm72_vm4, %v952_v32, %v69_v40  ;;  %v76_v44 = vmul.f32 %v954_v39, %v75_v41 }
 0x108   :  { %v84_v45 = vmul.f32 %v73_v43, %v50_v13 }
 0x109   :  { %v77_v47 = vmul.f32 0.5, %v76_v44 }
 0x10a   :  { %v87_v48 = vmul.f32 %v86_v42, %v84_v45 }
 0x10b   :  { %v78_v49 = vsub.f32 1.5, %v77_v47 }
 0x10c   :  { %v90_v50 = vadd.f32 %v89_v46, %v87_v48 }
 0x10d   :  { %v79_v51 = vmul.f32 %v954_v39, %v78_v49 }
 0x10e   :  { %873 = vmatmul.msk.f32.vlgmr.msra.gmra.mxu0 %vm34_vm0, %v90_v50 }
 0x10f   :  { %v83_v52 = vsel %vm82_vm7, %v954_v39, %v79_v51 }
 0x110   :  { %v85_v53 = vmul.f32 %v83_v52, %v51_v18 }
 0x112   :  { %v88_v54 = vmul.f32 %v86_v42, %v85_v53 }
 0x114   :  { %v91_v55 = vadd.f32 %v89_v46, %v88_v54 }
 0x116   :  { %874 = vmatmul.msk.f32.gmra.mxu0 %vm34_vm0, %v91_v55 }
 0x18b   :  { %v116_v57 = vpop.f32.mrf.mxu0 }
 0x18c   :  { %v1130_v58 = vadd.f32 %v116_v57, %v92_v56 }
 0x18e   :  { %128 = vrot.lane.b32.xlu1 %v1130_v58, %s1027_s6 }
 0x193   :  { %v119_v59 = vpop.f32.mrf.mxu0 }
 0x194   :  { %v1133_v60 = vadd.f32 %v119_v59, %v92_v56 }
 0x196   :  { %130 = vrot.lane.b32.xlu0 %v1133_v60, %s1027_s6  ;;  %126 = vrot.lane.b32.xlu2 %v1133_v60, %s1028_s7 }
 0x19e   :  { %124 = vrot.lane.b32.xlu2 %v1130_v58, %s1028_s7  ;;  %s861_s7 = sshll.u32 %s1464_s5, 4  ;;  %s862_s7 = int_to_ptr.hbm [resolvable:$true] %s861_s7 }
 0x1a6   :  { %134 = vrot.lane.b32.xlu2 %v1133_v60, %s1029_s8 }
 0x1ae   :  { %132 = vrot.lane.b32.xlu2 %v1130_v58, %s1029_s8  ;;  %s1036_s8 = smov [#allocation2]  }
 0x1f0   :  { %v1140_v61 = vpop.permute.xlu2 %126 }
 0x1f1   :  { %174 = vrot.lane.b32.xlu2 %v1140_v61, %s1030_s9 }
 0x1f8   :  { %v1143_v62 = vpop.permute.xlu2 %124 }
 0x1f9   :  { %172 = vrot.lane.b32.xlu0 %v1143_v62, %s1030_s9 }
 0x200   :  { %v1146_v63 = vpop.permute.xlu2 %134  ;;  %v1148_v1 = vpop.permute.xlu1 %128 }
 0x201   :  { %244 = vrot.lane.b32.xlu0 %v1146_v63, %s1030_s9  ;;  %207 = vrot.lane.b32.xlu1 %v1148_v1, %s1030_s9 }
 0x208   :  { %v1152_v3 = vpop.permute.xlu0 %130  ;;  %v1157_v4 = vpop.permute.xlu2 %132 }
 0x209   :  { %209 = vrot.lane.b32.xlu2 %v1152_v3, %s1030_s9  ;;  %136 = vrot.lane.b32.xlu0 %v1130_v58, %s1030_s9 }
 0x20a   :  { %138 = vrot.lane.b32.xlu1 %v1133_v60, %s1030_s9 }
 0x211   :  { %242 = vrot.lane.b32.xlu2 %v1157_v4, %s1030_s9  ;;  %s859_s9 = sshll.u32 %s1036_s8, 4  ;;  %s860_s9 = int_to_ptr.vmem [resolvable:$true] %s859_s9 }
 0x24b   :  { %v175_v5 = vpop.permute.xlu2 %174 }
 0x24c   :  { %879 = vmatpush.xpose.msk.msra.mxu2 %vm140_vm8, %v175_v5 }
 0x263   :  { %v210_v6 = vpop.permute.xlu2 %209 }
 0x264   :  { %883 = vmatpush.xpose.msk.msrb.mxu0 %vm140_vm8, %v210_v6  ;;  %905 = vmatpush.xpose.msk.msra.mxu3 %vm140_vm8, %v210_v6 }
 0x26b   :  { %v173_v7 = vpop.permute.xlu0 %172  ;;  %v243_v11 = vpop.permute.xlu2 %242 }
 0x26c   :  { %880 = vmatpush.xpose.msk.msra.mxu2 %vm140_vm8, %v173_v7 }
 0x26f   :  { %881 = vmatmul.msk.f32.vlgmr.msra.gmra.mxu2 %vm140_vm8, %v1143_v62 }
 0x273   :  { %v245_v8 = vpop.permute.xlu0 %244  ;;  %v208_v9 = vpop.permute.xlu1 %207 }
 0x274   :  { %884 = vmatpush.xpose.msk.msrb.mxu0 %vm140_vm8, %v208_v9  ;;  %906 = vmatpush.xpose.msk.msra.mxu3 %vm140_vm8, %v208_v9 }
 0x277   :  { %882 = vmatmul.msk.f32.gmra.mxu2 %vm140_vm8, %v1140_v61  ;;  %885 = vmatmul.msk.f32.vlgmr.msrb.gmra.mxu0 %vm140_vm8, %v1148_v1 }
 0x278   :  { %887 = vmatpush.xpose.msk.msra.mxu0 %vm140_vm8, %v245_v8  ;;  %886 = vmatmul.msk.f32.vlgmr.msra.gmra.mxu3 %vm140_vm8, %v1152_v3 }
 0x27b   :  { %v137_v13 = vpop.permute.xlu0 %136 }
 0x27c   :  { %888 = vmatpush.xpose.msk.msra.mxu0 %vm140_vm8, %v243_v11  ;;  %v139_v12 = vpop.permute.xlu1 %138 }
 0x27d   :  { %875 = vmatpush.xpose.msk.msra.mxu1 %vm140_vm8, %v139_v12 }
 0x27f   :  { %889 = vmatmul.msk.f32.vlgmr.msra.gmra.mxu0 %vm140_vm8, %v1157_v4 }
 0x281   :  { %876 = vmatpush.xpose.msk.msra.mxu1 %vm140_vm8, %v137_v13 }
 0x284   :  { %877 = vmatmul.msk.f32.vlgmr.msra.gmra.mxu1 %vm140_vm8, %v1130_v58 }
 0x287   :  { %890 = vmatmul.msk.f32.gmra.mxu0 %vm140_vm8, %v1146_v63 }
 0x28c   :  { %878 = vmatmul.msk.f32.gmra.mxu1 %vm140_vm8, %v1133_v60 }
 0x2f2   :  { %v201_v15 = vpop.f32.mrf.mxu2 }
 0x2f3   :  { %v202_v16 = vadd.f32 %v201_v15, %v23_v14 }
 0x2f4   :  { %v236_v17 = vpop.f32.mrf.mxu0 }
 0x2f5   :  { %v237_v18 = vadd.f32 %v236_v17, %v23_v14  ;;  %v284_v19 = vsel %vm277_vm9, %v202_v16, -inf }
 0x2f6   :  { %285 = vmax.xlane.f32.xlu2 %v284_v19 }
 0x2f7   :  { %v290_v20 = vsel %vm277_vm9, %v237_v18, -inf }
 0x2f8   :  { %291 = vmax.xlane.f32.xlu1 %v290_v20 }
 0x2fa   :  { %v204_v28 = vpop.f32.mrf.mxu2 }
 0x2fb   :  { %v205_v29 = vadd.f32 %v204_v28, %v24_v27  ;;  %v239_v30 = vpop.f32.mrf.mxu3 }
 0x2fc   :  { %v240_v31 = vadd.f32 %v239_v30, %v24_v27  ;;  %v271_v32 = vpop.f32.mrf.mxu0  ;;  %v919_v30 = vpack.i.bf16 %v1152_v3, %v1140_v61 }
 0x2fd   :  { %v272_v33 = vadd.f32 %v271_v32, %v23_v14  ;;  %v287_v34 = vsel %vm277_vm9, %v205_v29, -inf  ;;  %v929_v32 = vpack.i.bf16 %v1157_v4, %v1146_v63 }
 0x2fe   :  { %288 = vmax.xlane.f32.xlu0 %v287_v34  ;;  %v293_v36 = vsel %vm277_vm9, %v240_v31, -inf }
 0x2ff   :  { %v296_v35 = vsel %vm277_vm9, %v272_v33, -inf }
 0x300   :  { %297 = vmax.xlane.f32.xlu2 %v296_v35  ;;  %294 = vmax.xlane.f32.xlu1 %v293_v36 }
 0x301   :  { %v166_v37 = vpop.f32.mrf.mxu1 }
 0x302   :  { %v1197_v39 = vadd.f32 %v166_v37, %v23_v14 }
 0x304   :  { %v274_v40 = vpop.f32.mrf.mxu0  ;;  %v278_v43 = vsel %vm277_vm9, %v1197_v39, -inf }
 0x305   :  { %v275_v41 = vadd.f32 %v274_v40, %v24_v27 }
 0x307   :  { %v299_v42 = vsel %vm277_vm9, %v275_v41, -inf }
 0x308   :  { %300 = vmax.xlane.f32.xlu0 %v299_v42  ;;  %279 = vmax.xlane.f32.xlu2 %v278_v43 }
 0x309   :  { %v169_v44 = vpop.f32.mrf.mxu1 }
 0x30a   :  { %v170_v45 = vadd.f32 %v169_v44, %v24_v27 }
 0x30c   :  { %v281_v46 = vsel %vm277_vm9, %v170_v45, -inf }
 0x310   :  { %282 = vmax.xlane.f32.xlu0 %v281_v46 }
 0x369   :  { %v286_v47 = vpop.xlane.xlu2 %285 }
 0x36a   :  { %v304_v48 = vsub.f32 %v202_v16, %v286_v47 }
 0x36b   :  { %v292_v49 = vpop.xlane.xlu1 %291 }
 0x36c   :  { %v314_v50 = vmul.f32 1.442695, %v304_v48  ;;  %v306_v51 = vsub.f32 %v237_v18, %v292_v49 }
 0x36e   :  { %955 = vpow2.f32 %v314_v50  ;;  %v318_v52 = vmul.f32 1.442695, %v306_v51 }
 0x370   :  { %957 = vpow2.f32 %v318_v52 }
 0x371   :  { %v289_v53 = vpop.xlane.xlu0 %288 }
 0x372   :  { %v305_v54 = vsub.f32 %v205_v29, %v289_v53 }
 0x373   :  { %v298_v55 = vpop.xlane.xlu2 %297  ;;  %v295_v56 = vpop.xlane.xlu1 %294 }
 0x374   :  { %v1203_v57 = vpop.eup %955  ;;  %v316_v59 = vmul.f32 1.442695, %v305_v54  ;;  %v308_v5 = vsub.f32 %v272_v33, %v298_v55  ;;  %v307_v6 = vsub.f32 %v240_v31, %v295_v56  ;;  %v924_v31 = vpack.i.bf16 %v1148_v1, %v1143_v62 }
 0x375   :  { %v332_v7 = vsel %vm277_vm9, %v1203_v57, 0.0  ;;  %v934_v33 = vpack.i.bf16 %v1130_v58, %v1133_v60 }
 0x376   :  { %v1207_v8 = vpop.eup %957  ;;  %959 = vpow2.f32 %v316_v59  ;;  %v322_v9 = vmul.f32 1.442695, %v308_v5  ;;  %v320_v11 = vmul.f32 1.442695, %v307_v6  ;;  %333 = vadd.xlane.f32.xlu1 %v332_v7 }
 0x377   :  { %v338_v12 = vsel %vm277_vm9, %v1207_v8, 0.0 }
 0x378   :  { %961 = vpow2.f32 %v322_v9  ;;  %339 = vadd.xlane.f32.xlu2 %v338_v12 }
 0x379   :  { %963 = vpow2.f32 %v320_v11 }
 0x37b   :  { %v301_v13 = vpop.xlane.xlu0 %300  ;;  %v280_v34 = vpop.xlane.xlu2 %279 }
 0x37c   :  { %v1211_v14 = vpop.eup %959  ;;  %v309_v15 = vsub.f32 %v275_v41, %v301_v13  ;;  %v302_v35 = vsub.f32 %v1197_v39, %v280_v34 }
 0x37d   :  { %v335_v16 = vsel %vm277_vm9, %v1211_v14, 0.0 }
 0x37e   :  { %v1215_v17 = vpop.eup %961  ;;  %v324_v18 = vmul.f32 1.442695, %v309_v15  ;;  %336 = vadd.xlane.f32.xlu1 %v335_v16  ;;  %v310_v37 = vmul.f32 1.442695, %v302_v35 }
 0x37f   :  { %v1217_v19 = vpop.eup %963  ;;  %v344_v20 = vsel %vm277_vm9, %v1215_v17, 0.0 }
 0x380   :  { %965 = vpow2.f32 %v324_v18  ;;  %345 = vadd.xlane.f32.xlu0 %v344_v20  ;;  %v341_v27 = vsel %vm277_vm9, %v1217_v19, 0.0 }
 0x381   :  { %342 = vadd.xlane.f32.xlu2 %v341_v27  ;;  %967 = vpow2.f32 %v310_v37 }
 0x383   :  { %v283_v36 = vpop.xlane.xlu0 %282 }
 0x384   :  { %v303_v61 = vsub.f32 %v170_v45, %v283_v36 }
 0x386   :  { %v1223_v28 = vpop.eup %965  ;;  %v312_v3 = vmul.f32 1.442695, %v303_v61 }
 0x387   :  { %v347_v29 = vsel %vm277_vm9, %v1223_v28, 0.0  ;;  %v1236_v40 = vpop.eup %967 }
 0x388   :  { %348 = vadd.xlane.f32.xlu1 %v347_v29  ;;  %969 = vpow2.f32 %v312_v3  ;;  %v326_v62 = vsel %vm277_vm9, %v1236_v40, 0.0 }
 0x38e   :  { %v1240_v63 = vpop.eup %969 }
 0x38f   :  { %v329_v58 = vsel %vm277_vm9, %v1240_v63, 0.0 }
 0x394   :  { %920 = vrot.lane.b32.xlu0 %v919_v30, %s1031_s1 }
 0x399   :  { %925 = vrot.lane.b32.xlu2 %v924_v31, %s1031_s1 }
 0x3a1   :  { %930 = vrot.lane.b32.xlu1 %v929_v32, %s1031_s1 }
 0x3a9   :  { %935 = vrot.lane.b32.xlu1 %v934_v33, %s1031_s1 }
 0x3b1   :  { %940 = vrot.lane.b32.xlu1 %v939_v25, %s1032_s14 }
 0x3b9   :  { %945 = vrot.lane.b32.xlu1 %v944_v26, %s1032_s14 }
 0x3be   :  { %327 = vadd.xlane.f32.xlu0 %v326_v62 }
 0x3c2   :  { %330 = vadd.xlane.f32.xlu2 %v329_v58 }
 0x3e9   :  { %v334_v60 = vpop.xlane.xlu1 %333 }
 0x3ea   :  { %971 = vrcp.f32 %v334_v60  ;;  %vm383_vm10 = vweird.f32 %v334_v60  ;;  %v387_v51 = vand.u32 2147483647, %v334_v60  ;;  %v389_v55 = vand.u32 2147483648, %v334_v60 }
 0x3eb   :  { %v340_v1 = vpop.xlane.xlu2 %339 }
 0x3ec   :  { %973 = vrcp.f32 %v340_v1  ;;  %v415_v56 = vand.u32 2147483647, %v340_v1  ;;  %v417_v59 = vand.u32 2147483648, %v340_v1  ;;  %vm411_vm14 = vweird.f32 %v340_v1 }
 0x3ed   :  { %vm1278_vm15 = vcmp.eq.f32.partialorder %v387_v51, 8.507059e+37  ;;  %v390_v16 = vor.u32 1.1754944e-38, %v389_v55 }
 0x3ee   :  { %vm416_vm2 = vcmp.eq.f32.partialorder %v415_v56, 8.507059e+37  ;;  %v418_v18 = vor.u32 1.1754944e-38, %v417_v59 }
 0x3f0   :  { %v972_v4 = vpop.eup %971 }
 0x3f1   :  { %v1250_v39 = vpop.xlane.xlu1 %336  ;;  %v379_v42 = vmul.f32 %v972_v4, %v334_v60  ;;  %vm384_vm11 = vweird.f32 %v972_v4 }
 0x3f2   :  { %v974_v41 = vpop.eup %973  ;;  %975 = vrcp.f32 %v1250_v39  ;;  %vm1274_vm13 = vmor %vm383_vm10, %vm384_vm11  ;;  %vm397_vm3 = vweird.f32 %v1250_v39  ;;  %v403_v29 = vand.u32 2147483648, %v1250_v39  ;;  %v401_v32 = vand.u32 2147483647, %v1250_v39 }
 0x3f3   :  { %v407_v43 = vmul.f32 %v974_v41, %v340_v1  ;;  %v1255_v21 = vpop.xlane.xlu0 %345  ;;  %v380_v22 = vsub.f32 1.0, %v379_v42  ;;  %vm412_vm12 = vweird.f32 %v974_v41 }
 0x3f4   :  { %v1253_v44 = vpop.xlane.xlu2 %342  ;;  %vm1282_vm1 = vmor %vm411_vm14, %vm412_vm12  ;;  %vm402_vm12 = vcmp.eq.f32.partialorder %v401_v32, 8.507059e+37  ;;  %vm439_vm14 = vweird.f32 %v1255_v21 }
 0x3f5   :  { %977 = vrcp.f32 %v1253_v44  ;;  %v408_v23 = vsub.f32 1.0, %v407_v43  ;;  %v381_v26 = vmul.f32 %v972_v4, %v380_v22  ;;  %v431_v37 = vand.u32 2147483648, %v1253_v44 }
 0x3f6   :  { %979 = vrcp.f32 %v1255_v21  ;;  %vm425_vm6 = vweird.f32 %v1253_v44  ;;  %v429_v43 = vand.u32 2147483647, %v1253_v44 }
 0x3f7   :  { %v409_v45 = vmul.f32 %v974_v41, %v408_v23  ;;  %v382_v50 = vadd.f32 %v972_v4, %v381_v26  ;;  %v404_v23 = vor.u32 1.1754944e-38, %v403_v29 }
 0x3f8   :  { %v1259_v24 = vpop.eup %975 }
 0x3f9   :  { %v393_v46 = vmul.f32 %v1259_v24, %v1250_v39  ;;  %v410_v52 = vadd.f32 %v974_v41, %v409_v45  ;;  %v386_v13 = vsel %vm1274_vm13, %v972_v4, %v382_v50  ;;  %vm398_vm4 = vweird.f32 %v1259_v24 }
 0x3fa   :  { %v391_v35 = vsel %vm1278_vm15, %v390_v16, %v386_v13  ;;  %vm1314_vm7 = vmor %vm397_vm3, %vm398_vm4  ;;  %v445_v45 = vand.u32 2147483648, %v1255_v21  ;;  %vm430_vm13 = vcmp.eq.f32.partialorder %v429_v43, 8.507059e+37 }
 0x3fb   :  { %v1261_v25 = vpop.eup %977  ;;  %v1267_v48 = vpop.xlane.xlu1 %348  ;;  %v394_v53 = vsub.f32 1.0, %v393_v46  ;;  %v414_v15 = vsel %vm1282_vm1, %v974_v41, %v410_v52  ;;  %v464_v4 = vmul.f32 %v1203_v57, %v391_v35  ;;  %v443_v46 = vand.u32 2147483647, %v1255_v21 }
 0x3fc   :  { %v421_v47 = vmul.f32 %v1261_v25, %v1253_v44  ;;  %v1269_v49 = vpop.eup %979  ;;  %981 = vrcp.f32 %v1267_v48  ;;  %v926_v30 = vpop.permute.xlu2 %925  ;;  %v419_v36 = vsel %vm416_vm2, %v418_v18, %v414_v15  ;;  %vm426_vm5 = vweird.f32 %v1261_v25 }
 0x3fd   :  { %v435_v5 = vmul.f32 %v1269_v49, %v1255_v21  ;;  %v395_v11 = vmul.f32 %v1259_v24, %v394_v53  ;;  %v927_v60 = vunpack.i.l.bf16 %v926_v30  ;;  %v928_v1 = vunpack.i.h.bf16 %v926_v30  ;;  %vm1319_vm10 = vmor %vm425_vm6, %vm426_vm5 }
 0x3fe   :  { %v422_v54 = vsub.f32 1.0, %v421_v47  ;;  %v466_v41 = vmul.f32 %v1207_v8, %v419_v36  ;;  %vm440_vm11 = vweird.f32 %v1269_v49  ;;  %v432_v44 = vor.u32 1.1754944e-38, %v431_v37 }
 0x3ff   :  { %v436_v20 = vsub.f32 1.0, %v435_v5  ;;  %v396_v61 = vadd.f32 %v1259_v24, %v395_v11  ;;  %vm441_vm15 = vmor %vm439_vm14, %vm440_vm11  ;;  %v446_v51 = vor.u32 1.1754944e-38, %v445_v45  ;;  %vm444_vm1 = vcmp.eq.f32.partialorder %v443_v46, 8.507059e+37 }
 0x400   :  { %v423_v12 = vmul.f32 %v1261_v25, %v422_v54  ;;  %vm453_vm3 = vweird.f32 %v1267_v48 }
 0x401   :  { %v437_v62 = vmul.f32 %v1269_v49, %v436_v20  ;;  %v400_v57 = vsel %vm1314_vm7, %v1259_v24, %v396_v61 }
 0x402   :  { %v1292_v27 = vpop.eup %981  ;;  %v424_v3 = vadd.f32 %v1261_v25, %v423_v12  ;;  %v405_v47 = vsel %vm402_vm12, %v404_v23, %v400_v57 }
 0x403   :  { %v449_v58 = vmul.f32 %v1292_v27, %v1267_v48  ;;  %v438_v39 = vadd.f32 %v1269_v49, %v437_v62  ;;  %v465_v52 = vmul.f32 %v1211_v14, %v405_v47  ;;  %vm454_vm2 = vweird.f32 %v1292_v27 }
 0x404   :  { %v428_v8 = vsel %vm1319_vm10, %v1261_v25, %v424_v3  ;;  %vm455_vm4 = vmor %vm453_vm3, %vm454_vm2 }
 0x405   :  { %v450_v26 = vsub.f32 1.0, %v449_v58  ;;  %v433_v24 = vsel %vm430_vm13, %v432_v44, %v428_v8  ;;  %v442_v50 = vsel %vm441_vm15, %v1269_v49, %v438_v39  ;;  %v459_v49 = vand.u32 2147483648, %v1267_v48 }
 0x406   :  { %v921_v31 = vpop.permute.xlu0 %920  ;;  %v467_v53 = vmul.f32 %v1217_v19, %v433_v24  ;;  %v447_v55 = vsel %vm444_vm1, %v446_v51, %v442_v50  ;;  %v457_v19 = vand.u32 2147483647, %v1267_v48  ;;  %vm638_vm1 = vcmask 195584  }
 0x407   :  { %v922_v33 = vunpack.i.l.bf16 %v921_v31  ;;  %v923_v34 = vunpack.i.h.bf16 %v921_v31  ;;  %v451_v25 = vmul.f32 %v1292_v27, %v450_v26  ;;  %v468_v14 = vmul.f32 %v1215_v17, %v447_v55 }
 0x408   :  { %v460_v6 = vor.u32 1.1754944e-38, %v459_v49  ;;  %vm458_vm5 = vcmp.eq.f32.partialorder %v457_v19, 8.507059e+37 }
 0x409   :  { %531 = vmatpush.msrb.mxu2 %v922_v33  ;;  %566 = vmatpush.msrb.mxu3 %v923_v34  ;;  %v452_v21 = vadd.f32 %v1292_v27, %v451_v25 }
 0x40b   :  { %532 = vmatpush.msrb.mxu2 %v927_v60  ;;  %567 = vmatpush.msrb.mxu3 %v928_v1  ;;  %v456_v5 = vsel %vm455_vm4, %v1292_v27, %v452_v21 }
 0x40c   :  { %893 = vmatmul.msk.f32.vlgmr.msrb.gmra.mxu2 %vm277_vm9, %v464_v4  ;;  %895 = vmatmul.msk.f32.vlgmr.msrb.gmra.mxu3 %vm277_vm9, %v466_v41  ;;  %v461_v11 = vsel %vm458_vm5, %v460_v6, %v456_v5 }
 0x40d   :  { %v469_v13 = vmul.f32 %v1223_v28, %v461_v11 }
 0x413   :  { %v931_v54 = vpop.permute.xlu1 %930 }
 0x414   :  { %v932_v56 = vunpack.i.l.bf16 %v931_v54  ;;  %894 = vmatmul.msk.f32.gmra.mxu2 %vm277_vm9, %v465_v52  ;;  %896 = vmatmul.msk.f32.gmra.mxu3 %vm277_vm9, %v467_v53  ;;  %v933_v59 = vunpack.i.h.bf16 %v931_v54 }
 0x416   :  { %601 = vmatpush.msrb.mxu0 %v932_v56 }
 0x418   :  { %602 = vmatpush.msrb.mxu0 %v933_v59  ;;  %v641_v59 = vperm.slane %v1123_v38, 3 }
 0x419   :  { %897 = vmatmul.msk.f32.vlgmr.msrb.gmra.mxu0 %vm277_vm9, %v468_v14 }
 0x41b   :  { %v936_v7 = vpop.permute.xlu1 %935 }
 0x41c   :  { %v937_v9 = vunpack.i.l.bf16 %v936_v7  ;;  %v938_v12 = vunpack.i.h.bf16 %v936_v7 }
 0x41e   :  { %496 = vmatpush.msrb.mxu1 %v937_v9 }
 0x420   :  { %497 = vmatpush.msrb.mxu1 %v938_v12 }
 0x421   :  { %898 = vmatmul.msk.f32.gmra.mxu0 %vm277_vm9, %v469_v13 }
 0x431   :  { %v328_v17 = vpop.xlane.xlu0 %327 }
 0x432   :  { %983 = vrcp.f32 %v328_v17  ;;  %v361_v27 = vand.u32 2147483648, %v328_v17  ;;  %v359_v30 = vand.u32 2147483647, %v328_v17  ;;  %vm355_vm7 = vweird.f32 %v328_v17 }
 0x434   :  { %v362_v28 = vor.u32 1.1754944e-38, %v361_v27  ;;  %vm360_vm11 = vcmp.eq.f32.partialorder %v359_v30, 8.507059e+37  ;;  %v30_v30 = vld [vmem:[%s1461_s2 + $0x28] sm:$0xff] }
 0x435   :  { %v331_v48 = vpop.xlane.xlu2 %330 }
 0x436   :  { %985 = vrcp.f32 %v331_v48  ;;  %v375_v36 = vand.u32 2147483648, %v331_v48  ;;  %vm369_vm13 = vweird.f32 %v331_v48  ;;  %v373_v62 = vand.u32 2147483647, %v331_v48 }
 0x438   :  { %v984_v15 = vpop.eup %983  ;;  %v376_v60 = vor.u32 1.1754944e-38, %v375_v36  ;;  %vm374_vm15 = vcmp.eq.f32.partialorder %v373_v62, 8.507059e+37 }
 0x439   :  { %v351_v16 = vmul.f32 %v984_v15, %v328_v17  ;;  %vm356_vm6 = vweird.f32 %v984_v15 }
 0x43a   :  { %vm357_vm10 = vmor %vm355_vm7, %vm356_vm6 }
 0x43b   :  { %v352_v18 = vsub.f32 1.0, %v351_v16 }
 0x43c   :  { %v986_v20 = vpop.eup %985 }
 0x43d   :  { %v353_v29 = vmul.f32 %v984_v15, %v352_v18  ;;  %v365_v31 = vmul.f32 %v986_v20, %v331_v48  ;;  %vm370_vm12 = vweird.f32 %v986_v20 }
 0x43e   :  { %vm371_vm14 = vmor %vm369_vm13, %vm370_vm12 }
 0x43f   :  { %v354_v32 = vadd.f32 %v984_v15, %v353_v29  ;;  %v366_v33 = vsub.f32 1.0, %v365_v31  ;;  %v32_v29 = vld [vmem:[%s1461_s2 + $0x38] sm:$0xff] }
 0x440   :  { %758 = vmatpush.msra.mxu2 %v32_v29  ;;  %v28_v31 = vld [vmem:[%s1461_s2 + $0x18] sm:$0xff] }
 0x441   :  { %v367_v34 = vmul.f32 %v986_v20, %v366_v33  ;;  %v358_v35 = vsel %vm357_vm10, %v984_v15, %v354_v32  ;;  %v26_v32 = vld [vmem:[%s1461_s2 + $0x8] sm:$0xff] }
 0x442   :  { %v363_v37 = vsel %vm360_vm11, %v362_v28, %v358_v35  ;;  %759 = vmatpush.msra.mxu2 %v30_v30 }
 0x443   :  { %v462_v61 = vmul.f32 %v1236_v40, %v363_v37  ;;  %v368_v3 = vadd.f32 %v986_v20, %v367_v34 }
 0x444   :  { %760 = vmatpush.msra.mxu2 %v28_v31 }
 0x445   :  { %891 = vmatmul.msk.f32.vlgmr.msrb.gmra.mxu1 %vm277_vm9, %v462_v61  ;;  %v372_v58 = vsel %vm371_vm14, %v986_v20, %v368_v3 }
 0x446   :  { %v377_v1 = vsel %vm374_vm15, %v376_v60, %v372_v58  ;;  %761 = vmatpush.msra.mxu2 %v26_v32 }
 0x447   :  { %v463_v4 = vmul.f32 %v1240_v63, %v377_v1  ;;  %v941_v63 = vpop.permute.xlu1 %940 }
 0x448   :  { %v943_v57 = vunpack.i.h.bf16 %v941_v63  ;;  %v942_v8 = vunpack.i.l.bf16 %v941_v63 }
 0x44a   :  { %676 = vmatpush.msra.mxu1 %v942_v8 }
 0x44c   :  { %677 = vmatpush.msra.mxu1 %v943_v57 }
 0x44d   :  { %892 = vmatmul.msk.f32.gmra.mxu1 %vm277_vm9, %v463_v4  ;;  %v733_v4 = vperm.slane %v1123_v38, 4 }
 0x44f   :  { %v946_v39 = vpop.permute.xlu1 %945 }
 0x450   :  { %v948_v44 = vunpack.i.h.bf16 %v946_v39  ;;  %v947_v26 = vunpack.i.l.bf16 %v946_v39 }
 0x452   :  { %678 = vmatpush.msra.mxu1 %v947_v26 }
 0x454   :  { %679 = vmatpush.msra.mxu1 %v948_v44 }
 0x48f   :  { %v534_v41 = vpop.f32.mrf.mxu2  ;;  %v569_v42 = vpop.f32.mrf.mxu3 }
 0x490   :  { %620 = vrot.lane.b32.xlu0 %v569_v42, %s1033_s15 }
 0x496   :  { %v604_v43 = vpop.f32.mrf.mxu0 }
 0x497   :  { %v537_v22 = vpop.f32.mrf.mxu2  ;;  %628 = vrot.lane.b32.xlu1 %v604_v43, %s1034_s16  ;;  %v572_v40 = vpop.f32.mrf.mxu3  ;;  %v736_v43 = vperm.slane %v1123_v38, 5 }
 0x498   :  { %614 = vrot.lane.b32.xlu2 %v537_v22, %s1035_s17 }
 0x49e   :  { %v607_v23 = vpop.f32.mrf.mxu0 }
 0x49f   :  { %612 = vrot.lane.b32.xlu1 %v534_v41, %s1035_s17 }
 0x4a7   :  { %622 = vrot.lane.b32.xlu1 %v572_v40, %s1033_s15 }
 0x4af   :  { %630 = vrot.lane.b32.xlu1 %v607_v23, %s1034_s16 }
 0x4c2   :  { %v499_v46 = vpop.f32.mrf.mxu1 }
 0x4ca   :  { %v502_v54 = vpop.f32.mrf.mxu1 }
 0x4f2   :  { %v615_v53 = vpop.permute.xlu2 %614 }
 0x4f3   :  { %v635_v55 = vsel %vm140_vm8, %v502_v54, %v615_v53  ;;  %v820_v53 = vld [vmem:[%s1462_s3 + $0x48] sm:$0xff]  ;;  %v819_v54 = vld [vmem:[%s1462_s3 + $0x40] sm:$0xff] }
 0x502   :  { %v621_v24 = vpop.permute.xlu0 %620 }
 0x509   :  { %v629_v45 = vpop.permute.xlu1 %628 }
 0x511   :  { %v613_v47 = vpop.permute.xlu1 %612 }
 0x512   :  { %v634_v50 = vsel %vm140_vm8, %v499_v46, %v613_v47  ;;  %v826_v47 = vld [vmem:[%s1462_s3 + $0x78] sm:$0xff] }
 0x513   :  { %v636_v25 = vsel %vm277_vm9, %v634_v50, %v621_v24  ;;  %828 = vmatpush.msra.mxu3 %v826_v47  ;;  %v825_v24 = vld [vmem:[%s1462_s3 + $0x70] sm:$0xff]  ;;  %v824_v50 = vld [vmem:[%s1462_s3 + $0x68] sm:$0xff] }
 0x514   :  { %v639_v51 = vsel %vm638_vm1, %v636_v25, %v629_v45  ;;  %v823_v25 = vld [vmem:[%s1462_s3 + $0x60] sm:$0xff] }
 0x515   :  { %899 = vmatmul.msk.f32.vlgmr.msra.gmra.mxu1 %vm34_vm0, %v639_v51  ;;  %829 = vmatpush.msra.mxu3 %v825_v24  ;;  %v822_v51 = vld [vmem:[%s1462_s3 + $0x58] sm:$0xff] }
 0x517   :  { %830 = vmatpush.msra.mxu3 %v824_v50 }
 0x519   :  { %v623_v52 = vpop.permute.xlu1 %622  ;;  %831 = vmatpush.msra.mxu3 %v823_v25 }
 0x51a   :  { %v637_v56 = vsel %vm277_vm9, %v635_v55, %v623_v52  ;;  %v821_v52 = vld [vmem:[%s1462_s3 + $0x50] sm:$0xff]  ;;  %v818_v55 = vld [vmem:[%s1462_s3 + $0x38] sm:$0xff] }
 0x51b   :  { %832 = vmatpush.msra.mxu3 %v822_v51 }
 0x51d   :  { %833 = vmatpush.msra.mxu3 %v821_v52 }
 0x51f   :  { %834 = vmatpush.msra.mxu3 %v820_v53 }
 0x521   :  { %v631_v21 = vpop.permute.xlu1 %630  ;;  %835 = vmatpush.msra.mxu3 %v819_v54 }
 0x522   :  { %v640_v49 = vsel %vm638_vm1, %v637_v56, %v631_v21  ;;  %v817_v56 = vld [vmem:[%s1462_s3 + $0x30] sm:$0xff]  ;;  %v816_v21 = vld [vmem:[%s1462_s3 + $0x28] sm:$0xff] }
 0x523   :  { %900 = vmatmul.msk.f32.gmra.mxu1 %vm34_vm0, %v640_v49  ;;  %836 = vmatpush.msra.mxu3 %v818_v55  ;;  %v739_v49 = vperm.slane %v1123_v38, 6  ;;  %v812_v38 = vld [vmem:[%s1462_s3 + $0x8] sm:$0xff] }
 0x525   :  { %837 = vmatpush.msra.mxu3 %v817_v56 }
 0x527   :  { %838 = vmatpush.msra.mxu3 %v816_v21 }
 0x592   :  { %v681_v14 = vpop.f32.mrf.mxu1 }
 0x593   :  { %v682_v19 = vadd.f32 %v681_v14, %v641_v59  ;;  %v814_v14 = vld [vmem:[%s1462_s3 + $0x18] sm:$0xff] }
 0x595   :  { %v1366_v5 = vadd.f32 %v682_v19, %v1071_v0 }
 0x597   :  { %v689_v6 = vsel %vm34_vm0, %v1366_v5, 0.0 }
 0x598   :  { %690 = vadd.xlane.f32.xlu0 %v689_v6 }
 0x5a0   :  { %v684_v7 = vpop.f32.mrf.mxu1 }
 0x5a1   :  { %v685_v9 = vadd.f32 %v684_v7, %v641_v59  ;;  %v815_v59 = vld [vmem:[%s1462_s3 + $0x20] sm:$0xff]  ;;  %v813_v7 = vld [vmem:[%s1462_s3 + $0x10] sm:$0xff] }
 0x5a2   :  { %839 = vmatpush.msra.mxu3 %v815_v59 }
 0x5a3   :  { %v1371_v11 = vadd.f32 %v685_v9, %v1078_v2 }
 0x5a4   :  { %840 = vmatpush.msra.mxu3 %v814_v14 }
 0x5a5   :  { %v692_v12 = vsel %vm34_vm0, %v1371_v11, 0.0 }
 0x5a6   :  { %693 = vadd.xlane.f32.xlu1 %v692_v12  ;;  %841 = vmatpush.msra.mxu3 %v813_v7  ;;  %v811_v12 = vld [vmem:[%s1462_s3] sm:$0xff] }
 0x5a8   :  { %842 = vmatpush.msra.mxu3 %v812_v38 }
 0x5aa   :  { %843 = vmatpush.msra.mxu3 %v811_v12 }
 0x60b   :  { %v691_v13 = vpop.xlane.xlu0 %690 }
 0x60c   :  { %v695_v17 = vmul.f32 %v691_v13, %v1082_v10 }
 0x60e   :  { %v697_v48 = vsub.f32 %v1366_v5, %v695_v17 }
 0x610   :  { %v699_v0 = vmul.f32 %v697_v48, %v697_v48 }
 0x612   :  { %v701_v15 = vsel %vm34_vm0, %v699_v0, 0.0 }
 0x613   :  { %702 = vadd.xlane.f32.xlu2 %v701_v15 }
 0x619   :  { %v694_v16 = vpop.xlane.xlu1 %693 }
 0x61a   :  { %v696_v18 = vmul.f32 %v694_v16, %v1082_v10 }
 0x61c   :  { %v698_v20 = vsub.f32 %v1371_v11, %v696_v18 }
 0x61e   :  { %v700_v2 = vmul.f32 %v698_v20, %v698_v20 }
 0x620   :  { %v704_v27 = vsel %vm34_vm0, %v700_v2, 0.0 }
 0x621   :  { %705 = vadd.xlane.f32.xlu0 %v704_v27 }
 0x686   :  { %v703_v33 = vpop.xlane.xlu2 %702 }
 0x687   :  { %v707_v28 = vmul.f32 %v703_v33, %v1082_v10 }
 0x689   :  { %v709_v34 = vadd.f32 1e-05, %v707_v28 }
 0x68b   :  { %987 = vrsqrt.f32 %v709_v34  ;;  %vm717_vm9 = vweird.f32 %v709_v34 }
 0x691   :  { %v988_v35 = vpop.eup %987 }
 0x692   :  { %v712_v36 = vmul.f32 %v988_v35, %v709_v34  ;;  %vm718_vm8 = vweird.f32 %v988_v35 }
 0x693   :  { %vm719_vm2 = vmor %vm717_vm9, %vm718_vm8 }
 0x694   :  { %v713_v37 = vmul.f32 %v988_v35, %v712_v36  ;;  %v706_v61 = vpop.xlane.xlu0 %705 }
 0x695   :  { %v708_v3 = vmul.f32 %v706_v61, %v1082_v10 }
 0x696   :  { %v714_v62 = vmul.f32 0.5, %v713_v37 }
 0x697   :  { %v710_v58 = vadd.f32 1e-05, %v708_v3 }
 0x698   :  { %v715_v60 = vsub.f32 1.5, %v714_v62 }
 0x699   :  { %989 = vrsqrt.f32 %v710_v58  ;;  %vm727_vm4 = vweird.f32 %v710_v58 }
 0x69a   :  { %v716_v1 = vmul.f32 %v988_v35, %v715_v60 }
 0x69c   :  { %v720_v41 = vsel %vm719_vm2, %v988_v35, %v716_v1 }
 0x69d   :  { %v731_v42 = vmul.f32 %v720_v41, %v697_v48 }
 0x69f   :  { %v990_v22 = vpop.eup %989  ;;  %v734_v40 = vmul.f32 %v733_v4, %v731_v42 }
 0x6a0   :  { %v722_v23 = vmul.f32 %v990_v22, %v710_v58  ;;  %vm728_vm3 = vweird.f32 %v990_v22 }
 0x6a1   :  { %v737_v63 = vadd.f32 %v736_v43, %v734_v40  ;;  %vm729_vm5 = vmor %vm727_vm4, %vm728_vm3  ;;  %v999_v40 = vld [vmem:[%s1463_s4] sm:$0xff]  ;;  %s1037_s4 = smov 128  }
 0x6a2   :  { %v723_v57 = vmul.f32 %v990_v22, %v722_v23  ;;  %v827_v23 = vperm.slane %v999_v40, 7 }
 0x6a3   :  { %901 = vmatmul.msk.f32.vlgmr.msra.gmra.mxu2 %vm34_vm0, %v737_v63 }
 0x6a4   :  { %v724_v10 = vmul.f32 0.5, %v723_v57 }
 0x6a6   :  { %v725_v8 = vsub.f32 1.5, %v724_v10 }
 0x6a8   :  { %v726_v39 = vmul.f32 %v990_v22, %v725_v8 }
 0x6aa   :  { %v730_v44 = vsel %vm729_vm5, %v990_v22, %v726_v39 }
 0x6ab   :  { %v732_v26 = vmul.f32 %v730_v44, %v698_v20 }
 0x6ad   :  { %v735_v45 = vmul.f32 %v733_v4, %v732_v26 }
 0x6af   :  { %v738_v46 = vadd.f32 %v736_v43, %v735_v45 }
 0x6b1   :  { %902 = vmatmul.msk.f32.gmra.mxu2 %vm34_vm0, %v738_v46 }
 0x726   :  { %v763_v19 = vpop.f32.mrf.mxu2 }
 0x727   :  { %v764_v6 = vadd.f32 %v763_v19, %v739_v49 }
 0x729   :  { %v903_v9 = vmul.f32 -1.702, %v764_v6 }
 0x72b   :  { %v773_v13 = vmul.f32 1.442695, %v903_v9 }
 0x72d   :  { %991 = vpow2.f32 %v773_v13 }
 0x733   :  { %v992_v17 = vpop.eup %991 }
 0x734   :  { %v777_v48 = vadd.f32 1.0, %v992_v17  ;;  %v766_v0 = vpop.f32.mrf.mxu2 }
 0x735   :  { %v767_v15 = vadd.f32 %v766_v0, %v739_v49 }
 0x736   :  { %993 = vrcp.f32 %v777_v48  ;;  %v790_v29 = vand.u32 2147483648, %v777_v48  ;;  %v788_v32 = vand.u32 2147483647, %v777_v48  ;;  %vm784_vm7 = vweird.f32 %v777_v48 }
 0x737   :  { %v904_v16 = vmul.f32 -1.702, %v767_v15 }
 0x738   :  { %v791_v34 = vor.u32 1.1754944e-38, %v790_v29  ;;  %vm789_vm11 = vcmp.eq.f32.partialorder %v788_v32, 8.507059e+37 }
 0x739   :  { %v775_v18 = vmul.f32 1.442695, %v904_v16 }
 0x73b   :  { %995 = vpow2.f32 %v775_v18 }
 0x73c   :  { %v994_v20 = vpop.eup %993 }
 0x73d   :  { %v780_v2 = vmul.f32 %v994_v20, %v777_v48  ;;  %vm785_vm6 = vweird.f32 %v994_v20 }
 0x73e   :  { %vm786_vm10 = vmor %vm784_vm7, %vm785_vm6 }
 0x73f   :  { %v781_v27 = vsub.f32 1.0, %v780_v2 }
 0x741   :  { %v996_v30 = vpop.eup %995  ;;  %v782_v31 = vmul.f32 %v994_v20, %v781_v27 }
 0x742   :  { %v778_v33 = vadd.f32 1.0, %v996_v30 }
 0x743   :  { %v783_v28 = vadd.f32 %v994_v20, %v782_v31 }
 0x744   :  { %997 = vrcp.f32 %v778_v33  ;;  %v805_v58 = vand.u32 2147483648, %v778_v33  ;;  %v803_v1 = vand.u32 2147483647, %v778_v33  ;;  %vm799_vm13 = vweird.f32 %v778_v33 }
 0x745   :  { %v787_v35 = vsel %vm786_vm10, %v994_v20, %v783_v28 }
 0x746   :  { %v792_v36 = vsel %vm789_vm11, %v791_v34, %v787_v35  ;;  %v806_v41 = vor.u32 1.1754944e-38, %v805_v58  ;;  %vm804_vm15 = vcmp.eq.f32.partialorder %v803_v1, 8.507059e+37 }
 0x747   :  { %v809_v37 = vmul.f32 %v792_v36, %v764_v6 }
 0x749   :  { %844 = vmatmul.f32.vlgmr.msra.gmra.mxu3 %v809_v37 }
 0x74a   :  { %v998_v61 = vpop.eup %997 }
 0x74b   :  { %v795_v3 = vmul.f32 %v998_v61, %v778_v33  ;;  %vm800_vm12 = vweird.f32 %v998_v61 }
 0x74c   :  { %vm801_vm14 = vmor %vm799_vm13, %vm800_vm12 }
 0x74d   :  { %v796_v62 = vsub.f32 1.0, %v795_v3 }
 0x74f   :  { %v797_v60 = vmul.f32 %v998_v61, %v796_v62 }
 0x751   :  { %v798_v4 = vadd.f32 %v998_v61, %v797_v60 }
 0x753   :  { %v802_v42 = vsel %vm801_vm14, %v998_v61, %v798_v4 }
 0x754   :  { %v807_v43 = vsel %vm804_vm15, %v806_v41, %v802_v42 }
 0x755   :  { %v810_v22 = vmul.f32 %v807_v43, %v767_v15 }
 0x757   :  { %847 = vmatmul.f32.gmra.mxu3 %v810_v22 }
 0x7cc   :  { %v845_v63 = vpop.f32.mrf.mxu3 }
 0x7cd   :  { %v846_v57 = vadd.f32 %v845_v63, %v827_v23 }
 0x7cf   :  { %v851_v10 = vadd.f32 %v846_v57, %v1366_v5 }
 0x7d1   :  { %853 = vst.msk [vmem:[#allocation2] sm:$0xff] %vm34_vm0, %v851_v10 }
 0x7da   :  { %v848_v8 = vpop.f32.mrf.mxu3 }
 0x7db   :  { %v849_v39 = vadd.f32 %v848_v8, %v827_v23 }
 0x7dd   :  { %v852_v44 = vadd.f32 %v849_v39, %v1371_v11 }
 0x7df   :  { %854 = vst.msk [vmem:[#allocation2 + $0x8] sm:$0xff] %vm34_vm0, %v852_v44 }
 0x7e0   :  { %867 = dma.vmem_to_hbm [thread:$0]  %s860_s9, 256, %s862_s7, [#allocation3], %s1037_s4, %s1037_s4, %s1035_s17  }
 0x7e1   :  { %1024 = dma.done.wait [#allocation3], 256  }
 0x7e2   :  { %1025 = vsyncadd [#allocation3], 4294967040 }
 0x7e3   :  { %872 = vsyncpa [#allocation3], 1 }

</bundles_post_ra>
